<compile_context>
chip_gen: v6e
topology: v6e:2x2x1
jax: 0.10.0
libtpu: 0.0.40
codegen_flags: <defaults>
</compile_context>

<pallas_src>
import math

import jax
import jax.numpy as jnp
from jax import lax
from jax.experimental import pallas as pl
from jax.experimental.pallas import tpu as pltpu

# ---- Projection dims (sum = combined dim) ----
D1 = 16
D2 = 16
D_TOTAL = D1 + D2
LANES = 128
PACK = LANES // D_TOTAL          # 4 logical rows packed per lane-dense row
TILE_M = 4096                    # packed rows per grid step (multiple of 8)


def _round_up(n, m):
    return (n + m - 1) // m * m


def pack_params(w1, b1, w2, b2):
    """One-time (load-time) packing of parameters for the lane-dense kernel."""
    w_blk = jnp.zeros((D_TOTAL, D_TOTAL), jnp.float32)
    w_blk = w_blk.at[:D1, :D1].set(w1)
    w_blk = w_blk.at[D1:, D1:].set(w2)
    w_packed = jnp.kron(jnp.eye(PACK, dtype=jnp.float32), w_blk)          # (128, 128)
    b_packed = jnp.tile(
        jnp.concatenate([b1.reshape(-1), b2.reshape(-1)]), PACK)[None]    # (1, 128)
    # 0/1 f32 mask selecting the softplus lanes (second slice of each packed row)
    sp_mask = ((jnp.arange(LANES) % D_TOTAL) >= D1).astype(jnp.float32)[None]
    return w_packed, b_packed, sp_mask


def _combined_projection_kernel(x_ref, w_ref, b_ref, m_ref, o_ref):
    """One full-width MXU matmul + mask-blended softplus per (tile, 128) block."""
    z = jnp.dot(x_ref[...], w_ref[...], preferred_element_type=jnp.float32)
    z = z + b_ref[...]                                   # (tile, 128) + (1, 128)
    sp = jax.nn.softplus(z)
    o_ref[...] = (z + m_ref[...] * (sp - z)).astype(o_ref.dtype)


def combined_projection(x, w_packed, b_packed, sp_mask, *, tile_m=TILE_M):
    """x: (..., D_TOTAL) float32.  Returns same shape (float32)."""
    lead_shape = x.shape[:-1]
    m = math.prod(lead_shape) if lead_shape else 1
    x2d = x.reshape(m, D_TOTAL)

    # Lane-dense repack: (M, 32) -> (M/4, 128).  The reshape is a free
    # row-major relayout; only pad a tiny <=3-row tail when M % 4 != 0.
    m_pad = (-m) % PACK
    if m_pad:
        x2d = jnp.concatenate(
            [x2d, jnp.zeros((m_pad, D_TOTAL), x2d.dtype)], axis=0)
    rows = (m + m_pad) // PACK
    xp = x2d.reshape(rows, LANES)

    # Tile: big enough to amortize per-step pipeline overhead, but keep the
    # grid at >= 2 steps so both v7x TensorCores are used; sublane multiple of 8.
    tile = min(tile_m, max(8, _round_up(pl.cdiv(rows, 2), 8)))
    grid = pl.cdiv(rows, tile)   # ragged last block is masked by Pallas

    out = pl.pallas_call(
        _combined_projection_kernel,
        out_shape=jax.ShapeDtypeStruct((rows, LANES), jnp.float32),
        grid=(grid,),
        in_specs=[
            pl.BlockSpec((tile, LANES), lambda i: (i, 0)),    # packed activations
            pl.BlockSpec((LANES, LANES), lambda i: (0, 0)),   # packed weight (resident)
            pl.BlockSpec((1, LANES), lambda i: (0, 0)),       # packed bias (resident)
            pl.BlockSpec((1, LANES), lambda i: (0, 0)),       # softplus lane mask
        ],
        out_specs=pl.BlockSpec((tile, LANES), lambda i: (i, 0)),
        compiler_params=pltpu.CompilerParams(
            dimension_semantics=("parallel",)),
    )(xp, w_packed, b_packed, sp_mask)

    out = out.reshape(rows * PACK, D_TOTAL)[:m]
    return out.reshape(*lead_shape, D_TOTAL)


def _reference(x, w1, b1, w2, b2):
    """Pure-JAX f32 reference mirroring CombinedProjection.forward."""
    x1 = x[..., :D1]
    x2 = x[..., D1:D_TOTAL]
    y1 = jnp.dot(x1, w1, precision=lax.Precision.HIGHEST) + b1[0]
    y2 = jax.nn.softplus(jnp.dot(x2, w2, precision=lax.Precision.HIGHEST) + b2[0])
    return jnp.concatenate([y1, y2], axis=-1)


if __name__ == "__main__":
    key = jax.random.PRNGKey(0)
    k_x, k_w1, k_b1, k_w2, k_b2, k_x2, k_x3 = jax.random.split(key, 7)

    # Deterministic parameter init (synthetic, no checkpoint load)
    w1 = jax.random.normal(k_w1, (D1, D1), dtype=jnp.float32) * 0.1
    b1 = jax.random.normal(k_b1, (1, D1), dtype=jnp.float32) * 0.1
    w2 = jax.random.normal(k_w2, (D2, D2), dtype=jnp.float32) * 0.1
    b2 = jax.random.normal(k_b2, (1, D2), dtype=jnp.float32) * 0.1

    # One-time (load-time) parameter packing — kept out of the hot wrapper.
    w_packed, b_packed, sp_mask = pack_params(w1, b1, w2, b2)

    # The kernel dot runs at DEFAULT precision (bf16 inputs, f32 accumulation);
    # reference is full f32, so compare with a tolerance appropriate for K=16.
    ATOL = RTOL = 1e-2

    # Small shape: batch=2, seq=8, feature dim = D1 + D2 = 32 (single-tile path)
    batch, seq = 2, 8
    x = jax.random.normal(k_x, (batch, seq, D_TOTAL), dtype=jnp.float32)
    y = jax.block_until_ready(combined_projection(x, w_packed, b_packed, sp_mask))
    y_ref = _reference(x, w1, b1, w2, b2)
    assert y.shape == x.shape, (y.shape, x.shape)
    assert jnp.allclose(y, y_ref, atol=ATOL, rtol=RTOL), "mismatch vs reference (small)"

    # Larger shape to exercise the multi-tile (grid > 1) pipelined path
    xb = jax.random.normal(k_x2, (4, 1024, D_TOTAL), dtype=jnp.float32)
    yb = jax.block_until_ready(combined_projection(xb, w_packed, b_packed, sp_mask))
    yb_ref = _reference(xb, w1, b1, w2, b2)
    assert yb.shape == xb.shape, (yb.shape, xb.shape)
    assert jnp.allclose(yb, yb_ref, atol=ATOL, rtol=RTOL), "mismatch vs reference (tiled)"

    # Non-aligned M: exercises the tiny PACK tail pad + ragged last grid block
    xc = jax.random.normal(k_x3, (3, 37, D_TOTAL), dtype=jnp.float32)
    yc = jax.block_until_ready(combined_projection(xc, w_packed, b_packed, sp_mask))
    yc_ref = _reference(xc, w1, b1, w2, b2)
    assert yc.shape == xc.shape, (yc.shape, xc.shape)
    assert jnp.allclose(yc, yc_ref, atol=ATOL, rtol=RTOL), "mismatch vs reference (ragged)"

    print("KERNEL_OK")
</pallas_src>

<mosaic_0001>
module attributes {stable_mosaic.version = 11 : i64} {
  func.func @_combined_projection_kernel(%arg0: i32, %arg1: memref<8x128xf32, #tpu.memory_space<vmem>>, %arg2: memref<128x128xf32, #tpu.memory_space<vmem>>, %arg3: memref<1x128xf32, #tpu.memory_space<vmem>>, %arg4: memref<1x128xf32, #tpu.memory_space<vmem>>, %arg5: memref<8x128xf32, #tpu.memory_space<vmem>>) attributes {dimension_semantics = [#tpu.dimension_semantics<parallel>], iteration_bounds = array<i64: 1>, scalar_prefetch = 0 : i64, scratch_operands = 0 : i64, tpu.core_type = #tpu.core_type<tc>, window_params = [{transform_indices = @transform_0, window_bounds = array<i64: 8, 128>}, {pipeline_mode = #tpu.pipeline_mode<synchronous>, transform_indices = @transform_1, window_bounds = array<i64: 128, 128>}, {pipeline_mode = #tpu.pipeline_mode<synchronous>, transform_indices = @transform_2, window_bounds = array<i64: 1, 128>}, {pipeline_mode = #tpu.pipeline_mode<synchronous>, transform_indices = @transform_3, window_bounds = array<i64: 1, 128>}, {transform_indices = @transform_4, window_bounds = array<i64: 8, 128>}]} {
    %c0 = arith.constant 0 : index
    %c0_0 = arith.constant 0 : index
    %0 = vector.load %arg1[%c0, %c0_0] : memref<8x128xf32, #tpu.memory_space<vmem>>, vector<8x128xf32>
    %c0_1 = arith.constant 0 : index
    %c0_2 = arith.constant 0 : index
    %1 = vector.load %arg2[%c0_1, %c0_2] : memref<128x128xf32, #tpu.memory_space<vmem>>, vector<128x128xf32>
    %cst = arith.constant dense<0.000000e+00> : vector<8x128xf32>
    %2 = tpu.matmul %0, %1, %cst {dimension_numbers = #tpu.dot_dimension_numbers<[1], [0], [0], [1], [0, 0, 1, 1], [], []>} : vector<8x128xf32>, vector<128x128xf32>, vector<8x128xf32> -> vector<8x128xf32>
    %c0_3 = arith.constant 0 : index
    %c0_4 = arith.constant 0 : index
    %3 = vector.load %arg3[%c0_3, %c0_4] : memref<1x128xf32, #tpu.memory_space<vmem>>, vector<1x128xf32>
    %4 = vector.broadcast %3 : vector<1x128xf32> to vector<8x128xf32>
    %5 = arith.addf %2, %4 : vector<8x128xf32>
    %cst_5 = arith.constant 0.000000e+00 : f32
    %6 = vector.broadcast %cst_5 : f32 to vector<8x128xf32>
    %7 = arith.maximumf %5, %6 : vector<8x128xf32>
    %8 = vector.broadcast %cst_5 : f32 to vector<8x128xf32>
    %9 = arith.subf %5, %8 : vector<8x128xf32>
    %10 = arith.cmpf one, %9, %9 : vector<8x128xf32>
    %11 = vector.broadcast %cst_5 : f32 to vector<8x128xf32>
    %12 = arith.addf %5, %11 : vector<8x128xf32>
    %13 = math.absf %9 : vector<8x128xf32>
    %cst_6 = arith.constant 0.000000e+00 : f32
    %14 = vector.broadcast %cst_6 : f32 to vector<8x128xf32>
    %15 = arith.subf %14, %13 : vector<8x128xf32>
    %16 = math.exp %15 : vector<8x128xf32>
    %17 = math.log1p %16 : vector<8x128xf32>
    %18 = arith.addf %7, %17 : vector<8x128xf32>
    %19 = arith.select %10, %12, %18 : vector<8x128xi1>, vector<8x128xf32>
    %c0_7 = arith.constant 0 : index
    %c0_8 = arith.constant 0 : index
    %20 = vector.load %arg4[%c0_7, %c0_8] : memref<1x128xf32, #tpu.memory_space<vmem>>, vector<1x128xf32>
    %21 = arith.subf %19, %5 : vector<8x128xf32>
    %22 = vector.broadcast %20 : vector<1x128xf32> to vector<8x128xf32>
    %23 = arith.mulf %22, %21 : vector<8x128xf32>
    %24 = arith.addf %5, %23 : vector<8x128xf32>
    %c0_9 = arith.constant 0 : index
    %c0_10 = arith.constant 0 : index
    %25 = vector.load %arg5[%c0_9, %c0_10] : memref<8x128xf32, #tpu.memory_space<vmem>>, vector<8x128xf32>
    tpu.vector_store %arg5[%c0_9, %c0_10], %24 {strides = array<i32>} : memref<8x128xf32, #tpu.memory_space<vmem>>, vector<8x128xf32>,
    return
  }
  func.func @transform_0(%arg0: i32) -> (i32, i32) {
    %c0_i32 = arith.constant 0 : i32
    %c0_i32_0 = arith.constant 0 : i32
    return %arg0, %c0_i32 : i32, i32
  }
  func.func @transform_1(%arg0: i32) -> (i32, i32) {
    %c0_i32 = arith.constant 0 : i32
    %c0_i32_0 = arith.constant 0 : i32
    %c0_i32_1 = arith.constant 0 : i32
    return %c0_i32, %c0_i32_0 : i32, i32
  }
  func.func @transform_2(%arg0: i32) -> (i32, i32) {
    %c0_i32 = arith.constant 0 : i32
    %c0_i32_0 = arith.constant 0 : i32
    %c0_i32_1 = arith.constant 0 : i32
    return %c0_i32, %c0_i32_0 : i32, i32
  }
  func.func @transform_3(%arg0: i32) -> (i32, i32) {
    %c0_i32 = arith.constant 0 : i32
    %c0_i32_0 = arith.constant 0 : i32
    %c0_i32_1 = arith.constant 0 : i32
    return %c0_i32, %c0_i32_0 : i32, i32
  }
  func.func @transform_4(%arg0: i32) -> (i32, i32) {
    %c0_i32 = arith.constant 0 : i32
    %c0_i32_0 = arith.constant 0 : i32
    return %arg0, %c0_i32 : i32, i32
  }
}

</mosaic_0001>

<bundles_post_ra>
// kernel: tpu_custom_call.1
= control target key start
LH: loop header
LB: loop body
LE: loop exit
PB: predicated region body
PF: predicated region fallthrough
CT: control target
= control target key end

     0   :  { %9 = vsyncpa [#allocation3], 0  ;;  %s375_s0 = inlined_call_operand.hbm [shape: f32[4,128], index: 0, kind: input, shape index: {}]   ;;  %s376_s1 = inlined_call_operand.hbm [shape: f32[128,128], index: 1, kind: input, shape index: {}]   ;;  %s377_s2 = inlined_call_operand.vmem [shape: f32[1,128], index: 2, kind: input, shape index: {}]   ;;  %s378_s3 = inlined_call_operand.vmem [shape: f32[1,128], index: 3, kind: input, shape index: {}]   ;;  %s379_s4 = inlined_call_operand.hbm [shape: f32[4,128], index: 4, kind: output, shape index: {}]  }
   0x1   :  { %10 = vsyncpa [#allocation6], 0 }
   0x2   :  { %11 = vsyncpa [#allocation4], 0 }
   0x3   :  { %16 = vsyncadd [#allocation3], 64  ;;  %s320_s15 = smov [#allocation2]  }
   0x4   :  { %s17_s16 = sshll.u32 %s320_s15, 4  ;;  %s18_s16 = int_to_ptr.vmem [resolvable:$true] %s17_s16 }
   0x5   :  { %s262_s17 = scalar_lea.vmem %s18_s16, 64  ;;  %s266_s18 = scalar_lea.vmem %s18_s16, 128 }
   0x6   :  { %p263_p0 = scmp.ne.s32.totalorder %s18_s16, %s262_s17  ;;  %p267_p1 = scmp.lt.s32.totalorder %s18_s16, %s18_s16 }
   0x7   :  { %p268_p2 = scmp.lt.s32.totalorder %s266_s18, %s262_s17 }
   0x9   :  { %p269_p3 = por %p268_p2, %p267_p1 }
   0xb   :  { %p270_p4 = pnand %p269_p3, %p263_p0 }
   0xd   :  { %273 = shalt.err (!%p270_p4)
}
   0xe   :  { %s321_s19 = smov 64   ;;  %s322_s20 = smov 4  }
   0xf   :  { %23 = dma.hbm_to_vmem [thread:$0]  %s375_s0, 64, %s18_s16, [#allocation3], %s321_s19, %s321_s19, %s322_s20  }
  0x10   :  { %s323_s23 = smov [#allocation5]  }
  0x11   :  { %s29_s24 = sshll.u32 %s323_s23, 4  ;;  %s30_s24 = int_to_ptr.vmem [resolvable:$true] %s29_s24 }
  0x12   :  { %s282_s25 = scalar_lea.vmem %s30_s24, 2048  ;;  %p287_p6 = scmp.lt.s32.totalorder %s30_s24, %s30_s24 }
  0x13   :  { %p283_p5 = scmp.ne.s32.totalorder %s30_s24, %s282_s25  ;;  %p288_p7 = scmp.lt.s32.totalorder %s282_s25, %s282_s25 }
  0x15   :  { %p289_p8 = por %p288_p7, %p287_p6 }
  0x17   :  { %p290_p9 = pnand %p289_p8, %p283_p5 }
  0x19   :  { %293 = shalt.err (!%p290_p9)
}
  0x1a   :  { %s324_s26 = smov 128   ;;  %s325_s27 = smov 8  }
  0x1b   :  { %35 = dma.hbm_to_vmem [thread:$0]  %s376_s1, 2048, %s30_s24, [#allocation6], %s324_s26, %s324_s26, %s325_s27  }
  0x1c   :  { %314 = dma.done.wait [#allocation3], 128  }
  0x1d   :  { %315 = vsyncadd [#allocation3], 4294967168 }
  0x1e   :  { %316 = dma.done.wait [#allocation6], 2048  }
  0x1f   :  { %317 = vsyncadd [#allocation6], 4294965248  ;;  %v326_v0 = vmov 0.0   ;;  %vm327_vm0 = vmmov 0   ;;  %v62_v1 = vld [vmem:[#allocation5 + $0x78] sm:$0xff]  ;;  %v61_v2 = vld [vmem:[#allocation5 + $0x70] sm:$0xff] }
  0x20   :  { %206 = vmatprep.subr.mxu0 %v326_v0  ;;  %238 = vmatprep.mubr.msk.f32.mxu0 %vm327_vm0, %v326_v0  ;;  %v60_v3 = vld [vmem:[#allocation5 + $0x68] sm:$0xff]  ;;  %v59_v4 = vld [vmem:[#allocation5 + $0x60] sm:$0xff]  ;;  %v58_v5 = vld [vmem:[#allocation5 + $0x58] sm:$0xff] }
  0x21   :  { %207 = vmatpush3.msra.mxu0 %v62_v1  ;;  %v57_v6 = vld [vmem:[#allocation5 + $0x50] sm:$0xff]  ;;  %v56_v7 = vld [vmem:[#allocation5 + $0x48] sm:$0xff]  ;;  %v55_v8 = vld [vmem:[#allocation5 + $0x40] sm:$0xff] }
  0x22   :  { %208 = vmatprep.subr.mxu0 %v326_v0  ;;  %v54_v9 = vld [vmem:[#allocation5 + $0x38] sm:$0xff]  ;;  %v53_v10 = vld [vmem:[#allocation5 + $0x30] sm:$0xff]  ;;  %v52_v11 = vld [vmem:[#allocation5 + $0x28] sm:$0xff] }
  0x23   :  { %209 = vmatpush3.msra.mxu0 %v61_v2  ;;  %v51_v12 = vld [vmem:[#allocation5 + $0x20] sm:$0xff]  ;;  %v50_v13 = vld [vmem:[#allocation5 + $0x18] sm:$0xff]  ;;  %v49_v14 = vld [vmem:[#allocation5 + $0x10] sm:$0xff] }
  0x24   :  { %210 = vmatprep.subr.mxu0 %v326_v0  ;;  %v48_v15 = vld [vmem:[#allocation5 + $0x8] sm:$0xff]  ;;  %v47_v16 = vld [vmem:[#allocation5] sm:$0xff]  ;;  %v46_v17 = vld [vmem:[#allocation2] sm:$0xff] }
  0x25   :  { %211 = vmatpush3.msra.mxu0 %v60_v3  ;;  %v187_v18 = vld [vmem:[%s377_s2] ss:$0 sm:$0xff] }
  0x26   :  { %212 = vmatprep.subr.mxu0 %v326_v0  ;;  %v188_v37 = vld [vmem:[%s378_s3] ss:$0 sm:$0xff] }
  0x27   :  { %213 = vmatpush3.msra.mxu0 %v59_v4 }
  0x28   :  { %214 = vmatprep.subr.mxu0 %v326_v0 }
  0x29   :  { %215 = vmatpush3.msra.mxu0 %v58_v5 }
  0x2a   :  { %216 = vmatprep.subr.mxu0 %v326_v0 }
  0x2b   :  { %217 = vmatpush3.msra.mxu0 %v57_v6 }
  0x2c   :  { %218 = vmatprep.subr.mxu0 %v326_v0 }
  0x2d   :  { %219 = vmatpush3.msra.mxu0 %v56_v7 }
  0x2e   :  { %220 = vmatprep.subr.mxu0 %v326_v0 }
  0x2f   :  { %221 = vmatpush3.msra.mxu0 %v55_v8 }
  0x30   :  { %222 = vmatprep.subr.mxu0 %v326_v0 }
  0x31   :  { %223 = vmatpush3.msra.mxu0 %v54_v9 }
  0x32   :  { %224 = vmatprep.subr.mxu0 %v326_v0 }
  0x33   :  { %225 = vmatpush3.msra.mxu0 %v53_v10 }
  0x34   :  { %226 = vmatprep.subr.mxu0 %v326_v0 }
  0x35   :  { %227 = vmatpush3.msra.mxu0 %v52_v11 }
  0x36   :  { %228 = vmatprep.subr.mxu0 %v326_v0 }
  0x37   :  { %229 = vmatpush3.msra.mxu0 %v51_v12 }
  0x38   :  { %230 = vmatprep.subr.mxu0 %v326_v0 }
  0x39   :  { %231 = vmatpush3.msra.mxu0 %v50_v13 }
  0x3a   :  { %232 = vmatprep.subr.mxu0 %v326_v0 }
  0x3b   :  { %233 = vmatpush3.msra.mxu0 %v49_v14 }
  0x3c   :  { %234 = vmatprep.subr.mxu0 %v326_v0 }
  0x3d   :  { %235 = vmatpush3.msra.mxu0 %v48_v15 }
  0x3e   :  { %236 = vmatprep.subr.mxu0 %v326_v0 }
  0x3f   :  { %237 = vmatpush3.msra.mxu0 %v47_v16 }
  0x40   :  { %239 = vmatmul.mubr.f32.vlgmr.msra.gmra.mxu0 %v46_v17 }
 0x100   :  { %v136_v19 = vpop.f32.mrf.mxu0 }
 0x101   :  { %v137_v20 = vadd.f32 %v187_v18, %v136_v19 }
 0x102   :  { %v240_v21 = vpop.f32.mrf.mxu0 }
 0x103   :  { %v143_v22 = vand.u32 2147483647, %v137_v20  ;;  %v140_v33 = vmax.f32 %v137_v20, 0.0  ;;  %vm141_vm2 = vcmp.ne.f32.partialorder %v137_v20, %v137_v20 }
 0x105   :  { %v144_v23 = vsub.f32 0.0, %v143_v22 }
 0x107   :  { %v145_v24 = vmul.f32 1.442695, %v144_v23 }
 0x109   :  { %250 = vpow2.f32 %v145_v24 }
 0x116   :  { %v251_v25 = vpop.eup %250 }
 0x117   :  { %v147_v26 = vadd.f32 1.0, %v251_v25  ;;  %v150_v27 = vmul.f32 -0.5, %v251_v25  ;;  %v153_v29 = vand.u32 2147483647, %v251_v25 }
 0x119   :  { %252 = vlog2.f32 %v147_v26  ;;  %v151_v28 = vadd.f32 1.0, %v150_v27  ;;  %vm154_vm1 = vcmp.lt.f32.partialorder %v153_v29, 0.0004427343 }
 0x11b   :  { %v152_v32 = vmul.f32 %v251_v25, %v151_v28 }
 0x126   :  { %v253_v30 = vpop.eup %252 }
 0x127   :  { %v149_v31 = vmul.f32 0.6931472, %v253_v30 }
 0x129   :  { %v155_v34 = vsel %vm154_vm1, %v152_v32, %v149_v31 }
 0x12a   :  { %v156_v35 = vadd.f32 %v155_v34, %v140_v33 }
 0x12c   :  { %v157_v36 = vsel %vm141_vm2, %v137_v20, %v156_v35 }
 0x12d   :  { %v159_v38 = vsub.f32 %v157_v36, %v137_v20 }
 0x12f   :  { %v166_v39 = vmul.f32 %v188_v37, %v159_v38 }
 0x131   :  { %v167_v40 = vadd.f32 %v166_v39, %v137_v20 }
 0x133   :  { %168 = vst [vmem:[#allocation7] sm:$0xff] %v167_v40 }
 0x134   :  { %173 = vsyncadd [#allocation4], 64  ;;  %s328_s5 = smov [#allocation7]  }
 0x135   :  { %s174_s6 = sshll.u32 %s328_s5, 4  ;;  %s175_s6 = int_to_ptr.vmem [resolvable:$true] %s174_s6 }
 0x136   :  { %s294_s7 = scalar_lea.vmem %s175_s6, 64  ;;  %s298_s8 = scalar_lea.vmem %s175_s6, 128 }
 0x137   :  { %p295_p10 = scmp.ne.s32.totalorder %s175_s6, %s294_s7  ;;  %p299_p11 = scmp.lt.s32.totalorder %s175_s6, %s175_s6 }
 0x138   :  { %p300_p12 = scmp.lt.s32.totalorder %s298_s8, %s294_s7 }
 0x13a   :  { %p301_p13 = por %p300_p12, %p299_p11 }
 0x13c   :  { %p302_p0 = pnand %p301_p13, %p295_p10 }
 0x13e   :  { %305 = shalt.err (!%p302_p0)
}
 0x13f   :  { %180 = dma.vmem_to_hbm [thread:$0]  %s175_s6, 64, %s379_s4, [#allocation4], %s321_s19, %s321_s19, %s322_s20  }
 0x140   :  { %318 = dma.done.wait [#allocation4], 128  }
 0x141   :  { %319 = vsyncadd [#allocation4], 4294967168 }
 0x142   :  { %184 = vsyncpa [#allocation3], 1 }
 0x143   :  { %185 = vsyncpa [#allocation6], 1 }
 0x144   :  { %186 = vsyncpa [#allocation4], 1 }

</bundles_post_ra>
